<compile_context>
chip_gen: v7x
topology: tpu7x:2x2x1
jax: 0.10.0
libtpu: 0.0.40
codegen_flags: <defaults>
</compile_context>

<pallas_src>
import functools
import math
import random

import jax
import jax.numpy as jnp
from jax import lax
from jax.experimental import pallas as pl
from jax.experimental.pallas import tpu as pltpu


def _reflect_blur_1d(x, axis: int, w0: float, w1: float):
    """3-tap [w0, w1, w0] blur along `axis` with reflect padding (f32, VPU/XLU).

    Uses pltpu.roll for the +/-1 shifts.  The rolls are only used through their
    direction-symmetric sum, and the reflected edge values come from explicit
    width-1 slices of `x`, so correctness does not depend on the rotate
    direction convention.
    """
    n = x.shape[axis]
    if n == 1:
        return x  # both reflected neighbours are x itself and w1 + 2*w0 == 1
    r1 = pltpu.roll(x, 1, axis=axis)
    r2 = pltpu.roll(x, n - 1, axis=axis)
    s = r1 + r2  # interior: x[i-1] + x[i+1]; each end holds one wrapped term
    first = lax.slice_in_dim(x, 0, 1, axis=axis)
    second = lax.slice_in_dim(x, 1, 2, axis=axis)
    last = lax.slice_in_dim(x, n - 1, n, axis=axis)
    second_last = lax.slice_in_dim(x, n - 2, n - 1, axis=axis)
    idx = lax.broadcasted_iota(jnp.int32, x.shape, axis)
    # reflect: neighbours of x[0] are (x[1], x[1]); of x[n-1] are (x[n-2], x[n-2])
    s = jnp.where(idx == 0, s + (second - last), s)
    s = jnp.where(idx == n - 1, s + (second_last - first), s)
    return w1 * x + w0 * s


def _blur_kernel(x_ref, o_ref, *, w0: float, w1: float):
    # x_ref / o_ref: (P, H, W) slab of independent image planes in VMEM.
    x = x_ref[...].astype(jnp.float32)
    y = _reflect_blur_1d(x, axis=2, w0=w0, w1=w1)   # blur along W (lane axis)
    y = _reflect_blur_1d(y, axis=1, w0=w0, w1=w1)   # blur along H (sublane axis)
    o_ref[...] = y.astype(o_ref.dtype)


def _vmem_capacity_bytes() -> int:
    try:
        cap = getattr(pltpu.get_tpu_info(), "vmem_capacity_bytes", None)
        if cap:
            return int(cap)
    except Exception:
        pass
    return 64 * 1024 * 1024  # conservative default (v7x per-core VMEM)


@functools.partial(jax.jit, static_argnames=("sigma",))
def gaussian_blur_3x3(x: jnp.ndarray, *, sigma: float = 1.0) -> jnp.ndarray:
    """BYOL-style 3x3 Gaussian blur of an NCHW tensor (the `fn` of RandomApply)."""
    # TODO(synk): BYOL samples sigma uniformly per call (e.g. 0.1..2.0); fixed here.
    n, c, h, w = x.shape
    nc = n * c
    x3 = x.reshape(nc, h, w)                  # fold N, C -> one plane axis

    # Static 3-tap Gaussian weights (sum to 1), computed as Python floats.
    g = math.exp(-1.0 / (2.0 * sigma * sigma))
    w1 = 1.0 / (1.0 + 2.0 * g)
    w0 = g / (1.0 + 2.0 * g)

    # Generation-aware block sizing: ~6 MiB slabs on v5e/v6e (128 MiB VMEM),
    # ~3 MiB on v7x (64 MiB).  Budget leaves room for the double-buffered
    # in/out pipeline blocks plus the kernel's f32 temporaries.
    vmem_limit = (3 * _vmem_capacity_bytes()) // 4
    block_budget = max(1 << 20, min(8 << 20, vmem_limit // 16))
    plane_bytes = h * w * x.dtype.itemsize
    # TODO(synk): planes larger than the block budget would need H/W tiling.
    planes = max(1, min(nc, block_budget // max(plane_bytes, 1)))
    if nc >= 2:
        planes = min(planes, pl.cdiv(nc, 2))  # >= 2 blocks so v7x's 2 TCs split the grid
    grid = pl.cdiv(nc, planes)                # ragged tail block OK (planes independent)

    out3 = pl.pallas_call(
        functools.partial(_blur_kernel, w0=w0, w1=w1),
        out_shape=jax.ShapeDtypeStruct((nc, h, w), x.dtype),
        grid=(grid,),
        in_specs=[pl.BlockSpec((planes, h, w), lambda i: (i, 0, 0))],
        out_specs=pl.BlockSpec((planes, h, w), lambda i: (i, 0, 0)),
        compiler_params=pltpu.CompilerParams(
            dimension_semantics=("parallel",),
            vmem_limit_bytes=int(vmem_limit),
        ),
    )(x3)
    # TODO(synk): for W < 128 the output stores are lane-masked; folding planes
    # into lanes would need an extra HBM transpose and is not worth it for
    # realistic (>=128 px) BYOL crops.
    return out3.reshape(n, c, h, w)


class RandomApply:
    """Mirror of the PyTorch RandomApply module: host coin flip, then fn or identity."""

    def __init__(self, fn, p):
        self.fn = fn
        self.p = p

    def __call__(self, x):
        # TODO(synk): like the PyTorch module the flip is per-call (not per-sample)
        # and must stay outside jax.jit, otherwise the branch would be baked in.
        if random.random() > self.p:
            return x            # identity path: no kernel launch, no HBM traffic
        return self.fn(x)


def _blur_reference(x: jnp.ndarray, sigma: float) -> jnp.ndarray:
    """Pure-JAX f32 reference: separable 3-tap Gaussian, reflect padding."""
    g = math.exp(-1.0 / (2.0 * sigma * sigma))
    wts = [g / (1.0 + 2.0 * g), 1.0 / (1.0 + 2.0 * g), g / (1.0 + 2.0 * g)]
    _, _, h, w = x.shape
    xp = jnp.pad(x, ((0, 0), (0, 0), (1, 1), (1, 1)), mode="reflect")
    out = jnp.zeros_like(x)
    for dy in range(3):
        for dx in range(3):
            out = out + (wts[dy] * wts[dx]) * xp[:, :, dy:dy + h, dx:dx + w]
    return out


if __name__ == "__main__":
    key = jax.random.PRNGKey(0)
    x = jax.random.normal(key, (2, 4, 16, 16), dtype=jnp.float32)

    # --- exercise the blur (`fn`) path directly so the kernel always runs ----
    blurred = jax.block_until_ready(gaussian_blur_3x3(x, sigma=1.0))
    blur_ref = _blur_reference(x, sigma=1.0)
    assert blurred.shape == x.shape and blurred.dtype == x.dtype
    # kernel is f32 end-to-end now -> tight tolerance
    assert jnp.allclose(blurred, blur_ref, atol=1e-4, rtol=1e-4), (
        float(jnp.max(jnp.abs(blurred - blur_ref))))

    # --- RandomApply semantics: coin flip selects fn(x) or the free identity --
    p = 0.5
    random.seed(0)
    aug = RandomApply(gaussian_blur_3x3, p)
    out = jax.block_until_ready(aug(x))
    random.seed(0)
    applied = not (random.random() > p)
    ref = blur_ref if applied else x
    assert jnp.allclose(out, ref, atol=1e-4, rtol=1e-4)

    print("KERNEL_OK")
</pallas_src>

<mosaic_0001>
module attributes {stable_mosaic.version = 11 : i64} {
  func.func @_blur_kernel(%arg0: i32, %arg1: memref<4x16x16xf32, #tpu.memory_space<vmem>>, %arg2: memref<4x16x16xf32, #tpu.memory_space<vmem>>) attributes {dimension_semantics = [#tpu.dimension_semantics<parallel>], iteration_bounds = array<i64: 2>, scalar_prefetch = 0 : i64, scratch_operands = 0 : i64, tpu.core_type = #tpu.core_type<tc>, window_params = [{transform_indices = @transform_0, window_bounds = array<i64: 4, 16, 16>}, {transform_indices = @transform_1, window_bounds = array<i64: 4, 16, 16>}]} {
    %c0 = arith.constant 0 : index
    %c0_0 = arith.constant 0 : index
    %c0_1 = arith.constant 0 : index
    %0 = vector.load %arg1[%c0, %c0_0, %c0_1] : memref<4x16x16xf32, #tpu.memory_space<vmem>>, vector<4x16x16xf32>
    %c1_i32 = arith.constant 1 : i32
    %1 = tpu.dynamic_rotate %0 by %c1_i32 dim 2 : vector<4x16x16xf32>, i32 -> vector<4x16x16xf32>
    %c15_i32 = arith.constant 15 : i32
    %2 = tpu.dynamic_rotate %0 by %c15_i32 dim 2 : vector<4x16x16xf32>, i32 -> vector<4x16x16xf32>
    %3 = arith.addf %1, %2 : vector<4x16x16xf32>
    %4 = vector.extract_strided_slice %0 {offsets = [0, 0, 0], sizes = [4, 16, 1], strides = [1, 1, 1]} : vector<4x16x16xf32> to vector<4x16x1xf32>
    %5 = vector.extract_strided_slice %0 {offsets = [0, 0, 1], sizes = [4, 16, 1], strides = [1, 1, 1]} : vector<4x16x16xf32> to vector<4x16x1xf32>
    %6 = vector.extract_strided_slice %0 {offsets = [0, 0, 15], sizes = [4, 16, 1], strides = [1, 1, 1]} : vector<4x16x16xf32> to vector<4x16x1xf32>
    %7 = vector.extract_strided_slice %0 {offsets = [0, 0, 14], sizes = [4, 16, 1], strides = [1, 1, 1]} : vector<4x16x16xf32> to vector<4x16x1xf32>
    %8 = tpu.iota {dimensions = array<i32: 2>} : vector<4x16x16xi32>
    %c0_i32 = arith.constant 0 : i32
    %9 = vector.broadcast %c0_i32 : i32 to vector<4x16x16xi32>
    %10 = arith.cmpi eq, %8, %9 : vector<4x16x16xi32>
    %11 = arith.subf %5, %6 : vector<4x16x1xf32>
    %12 = vector.broadcast %11 : vector<4x16x1xf32> to vector<4x16x16xf32>
    %13 = arith.addf %3, %12 : vector<4x16x16xf32>
    %14 = arith.select %10, %13, %3 : vector<4x16x16xi1>, vector<4x16x16xf32>
    %c15_i32_2 = arith.constant 15 : i32
    %15 = vector.broadcast %c15_i32_2 : i32 to vector<4x16x16xi32>
    %16 = arith.cmpi eq, %8, %15 : vector<4x16x16xi32>
    %17 = arith.subf %7, %4 : vector<4x16x1xf32>
    %18 = vector.broadcast %17 : vector<4x16x1xf32> to vector<4x16x16xf32>
    %19 = arith.addf %14, %18 : vector<4x16x16xf32>
    %20 = arith.select %16, %19, %14 : vector<4x16x16xi1>, vector<4x16x16xf32>
    %cst = arith.constant 0.451862752 : f32
    %21 = vector.broadcast %cst : f32 to vector<4x16x16xf32>
    %22 = arith.mulf %21, %0 : vector<4x16x16xf32>
    %cst_3 = arith.constant 0.274068624 : f32
    %23 = vector.broadcast %cst_3 : f32 to vector<4x16x16xf32>
    %24 = arith.mulf %23, %20 : vector<4x16x16xf32>
    %25 = arith.addf %22, %24 : vector<4x16x16xf32>
    %c1_i32_4 = arith.constant 1 : i32
    %26 = tpu.dynamic_rotate %25 by %c1_i32_4 dim 1 : vector<4x16x16xf32>, i32 -> vector<4x16x16xf32>
    %c15_i32_5 = arith.constant 15 : i32
    %27 = tpu.dynamic_rotate %25 by %c15_i32_5 dim 1 : vector<4x16x16xf32>, i32 -> vector<4x16x16xf32>
    %28 = arith.addf %26, %27 : vector<4x16x16xf32>
    %29 = vector.extract_strided_slice %25 {offsets = [0, 0, 0], sizes = [4, 1, 16], strides = [1, 1, 1]} : vector<4x16x16xf32> to vector<4x1x16xf32>
    %30 = vector.extract_strided_slice %25 {offsets = [0, 1, 0], sizes = [4, 1, 16], strides = [1, 1, 1]} : vector<4x16x16xf32> to vector<4x1x16xf32>
    %31 = vector.extract_strided_slice %25 {offsets = [0, 15, 0], sizes = [4, 1, 16], strides = [1, 1, 1]} : vector<4x16x16xf32> to vector<4x1x16xf32>
    %32 = vector.extract_strided_slice %25 {offsets = [0, 14, 0], sizes = [4, 1, 16], strides = [1, 1, 1]} : vector<4x16x16xf32> to vector<4x1x16xf32>
    %33 = tpu.iota {dimensions = array<i32: 1>} : vector<4x16x16xi32>
    %c0_i32_6 = arith.constant 0 : i32
    %34 = vector.broadcast %c0_i32_6 : i32 to vector<4x16x16xi32>
    %35 = arith.cmpi eq, %33, %34 : vector<4x16x16xi32>
    %36 = arith.subf %30, %31 : vector<4x1x16xf32>
    %37 = vector.broadcast %36 : vector<4x1x16xf32> to vector<4x16x16xf32>
    %38 = arith.addf %28, %37 : vector<4x16x16xf32>
    %39 = arith.select %35, %38, %28 : vector<4x16x16xi1>, vector<4x16x16xf32>
    %c15_i32_7 = arith.constant 15 : i32
    %40 = vector.broadcast %c15_i32_7 : i32 to vector<4x16x16xi32>
    %41 = arith.cmpi eq, %33, %40 : vector<4x16x16xi32>
    %42 = arith.subf %32, %29 : vector<4x1x16xf32>
    %43 = vector.broadcast %42 : vector<4x1x16xf32> to vector<4x16x16xf32>
    %44 = arith.addf %39, %43 : vector<4x16x16xf32>
    %45 = arith.select %41, %44, %39 : vector<4x16x16xi1>, vector<4x16x16xf32>
    %cst_8 = arith.constant 0.451862752 : f32
    %46 = vector.broadcast %cst_8 : f32 to vector<4x16x16xf32>
    %47 = arith.mulf %46, %25 : vector<4x16x16xf32>
    %cst_9 = arith.constant 0.274068624 : f32
    %48 = vector.broadcast %cst_9 : f32 to vector<4x16x16xf32>
    %49 = arith.mulf %48, %45 : vector<4x16x16xf32>
    %50 = arith.addf %47, %49 : vector<4x16x16xf32>
    %c0_10 = arith.constant 0 : index
    %c0_11 = arith.constant 0 : index
    %c0_12 = arith.constant 0 : index
    %51 = vector.load %arg2[%c0_10, %c0_11, %c0_12] : memref<4x16x16xf32, #tpu.memory_space<vmem>>, vector<4x16x16xf32>
    tpu.vector_store %arg2[%c0_10, %c0_11, %c0_12], %50 {strides = array<i32>} : memref<4x16x16xf32, #tpu.memory_space<vmem>>, vector<4x16x16xf32>,
    return
  }
  func.func @transform_0(%arg0: i32) -> (i32, i32, i32) {
    %c0_i32 = arith.constant 0 : i32
    %c0_i32_0 = arith.constant 0 : i32
    %c0_i32_1 = arith.constant 0 : i32
    return %arg0, %c0_i32, %c0_i32_0 : i32, i32, i32
  }
  func.func @transform_1(%arg0: i32) -> (i32, i32, i32) {
    %c0_i32 = arith.constant 0 : i32
    %c0_i32_0 = arith.constant 0 : i32
    %c0_i32_1 = arith.constant 0 : i32
    return %arg0, %c0_i32, %c0_i32_0 : i32, i32, i32
  }
}

</mosaic_0001>

<bundles_post_ra>
// kernel: gaussian_blur_3x3.1
= control target key start
LH: loop header
LB: loop body
LE: loop exit
PB: predicated region body
PF: predicated region fallthrough
CT: control target
= control target key end

     0   :  { %6 = vsyncpa [#allocation3], 0  ;;  %s1439_s0 = inlined_call_operand.hbm [shape: f32[8,16,16], index: 0, kind: input, shape index: {}]   ;;  %s1440_s1 = inlined_call_operand.hbm [shape: f32[8,16,16], index: 1, kind: output, shape index: {}]  }
   0x1   :  { %8 = vsyncpa [#allocation3 + $0x1], 0 }
   0x2   :  { %9 = vsyncpa [#allocation4], 0 }
   0x3   :  { %11 = vsyncpa [#allocation4 + $0x1], 0  ;;  %s977_s6 = smov 0   ;;  %s979_s7 = smov 0  }
   0x4   :  { %s981_s8 = smov 0   ;;  %s983_s9 = smov 0  }
   0x5 LB: > { %s998_s10 = sadd.s32 4294967295, %s953_s9   ;;  %s777_s11 = sadd.s32 4294967294, %s953_s9   ;;  %s953_s9 = sphi %s983_s9, %s1453_s9   ;;  %s949_s8 = sphi %s981_s8, %s1452_s8   ;;  %s945_s7 = sphi %s979_s7, %s1451_s7   ;;  %s941_s6 = sphi %s977_s6, %s1450_s6  }
   0x6   : > { %s1002_s12 = sadd.s32 1, %s953_s9   ;;  %s24_s13 = sadd.s32 1, %s949_s8 }
   0x7   : > { %s21_s14 = ssub.s32 %s953_s9, %s1002_s12  ;;  %p31_p0 = scmp.ne.s32.totalorder %s949_s8, %s945_s7 }
   0x8   : > { %p22_p1 = scmp.eq.s32.totalorder %s21_s14, 0  ;;  %p32_p2 = scmp.eq.s32.totalorder %s953_s9, 0 }
   0x9   : > { %p37_p3 = scmp.ne.s32.totalorder %s945_s7, %s941_s6  ;;  %p38_p4 = scmp.eq.s32.totalorder %s998_s10, 0 }
   0xa   : > { %s1014_s15 = scalar_select %p22_p1, %s949_s8, %s24_s13  }
   0xb   : > { %p1016_p5 = por %p32_p2, %p31_p0  ;;  %p1020_p6 = por %p38_p4, %p37_p3 }
   0xc   : > { %p61_p7 = scmp.eq.s32.totalorder %s998_s10, 1  ;;  %p67_p8 = scmp.eq.s32.totalorder %s777_s11, 1 }
   0xd   : > { %p809_p10 = scmp.lt.s32.totalorder %s953_s9, 2  ;;  %s87_s20 = sand.u32 1, %s949_s8  }
   0xe   : > { %p1027_p11 = por %p61_p7, %p31_p0  ;;  %p1031_p12 = por %p67_p8, %p37_p3 }
   0xf   : > { %s794_s21 = sshll.u32 %s953_s9, 10  ;;  %s780_s22 = sshll.u32 %s87_s20, 6 }
  0x10   : > { %s1444_s18 = scalar_select %p1027_p11, 1, 0 }
  0x11   : > { %s1445_s19 = scalar_select %p1031_p12, 1, 0 }
  0x12   : > { %s1040_s25 = scalar_lea.hbm %s1439_s0, %s794_s21  ;;  %s91_s26 = scalar_lea.vmem [#allocation2], %s780_s22 }
  0x13   : > { %s99_s27 = sshll.u32 %s91_s26, 4  ;;  %p1044_p13 = pnand %p809_p10, %p1016_p5  ;;  %s1048_s27 = int_to_ptr.vmem [resolvable:$true] %s99_s27 }
  0x14   : > { %s1050_s29 = scalar_lea.sflag [#allocation3], %s87_s20  ;;  %s857_s30 = scalar_lea.hbm %s1040_s25, 1024 }
  0x15   : > { %p858_p0 = scmp.ne.s32.totalorder %s1040_s25, %s857_s30  ;;  %p859_p1 = pneg %p1044_p13 }
  0x16   : > { %s862_s4 = scalar_lea.hbm %s1439_s0, 2048  ;;  %p863_p4 = scmp.lt.u32.totalorder %s1040_s25, %s1439_s0 }
  0x17   : > { %p860_p2 = pnand %p859_p1, %p858_p0  ;;  %p864_p5 = scmp.lt.u32.totalorder %s862_s4, %s857_s30 }
  0x18   : > { %p866_p8 = scmp.lt.u32.totalorder %s857_s30, %s1040_s25 }
  0x19   : > { %p861_p3 = pneg %p860_p2  ;;  %p865_p7 = por %p864_p5, %p863_p4 }
  0x1b   : > { %p867_p10 = por %p866_p8, %p865_p7 }
  0x1d   : > { %p868_p9 = pnand %p867_p10, %p861_p3 }
  0x1f   : > { %871 = shalt.err (!%p868_p9)
}
  0x20   : > { %s872_s13 = scalar_lea.vmem %s1048_s27, 1024  ;;  %s955_s14 = smov [#allocation2]  }
  0x21   : > { %p873_p0 = scmp.ne.s32.totalorder %s1048_s27, %s872_s13  ;;  %s877_s16 = sshll.u32 %s955_s14, 4  ;;  %s878_s16 = int_to_ptr.vmem [resolvable:$false] %s877_s16 }
  0x22   : > { %s879_s20 = scalar_lea.vmem %s878_s16, 2048  ;;  %p880_p11 = scmp.lt.s32.totalorder %s1048_s27, %s878_s16 }
  0x23   : > { %p875_p2 = pnand %p873_p0, %p859_p1  ;;  %p881_p4 = scmp.lt.s32.totalorder %s879_s20, %s872_s13 }
  0x25   : > { %p876_p12 = pneg %p875_p2  ;;  %p882_p5 = por %p881_p4, %p880_p11 }
  0x27   : > { %p883_p7 = pnand %p882_p5, %p876_p12 }
  0x29   : > { %886 = shalt.err (!%p883_p7)
}
  0x2a   : > { %s956_s21 = smov 128   ;;  %s957_s22 = smov 8  }
  0x2b   : > { %804 = dma.hbm_to_vmem [thread:$0]  (!%p1044_p13), %s1040_s25, 1024, %s1048_s27, %s1050_s29, %s956_s21, %s956_s21, %s957_s22  }
  0x2c   : > { %p784_p9 = scmp.ge.s32.totalorder %s953_s9, 1  ;;  %p107_p1 = scmp.lt.s32.totalorder %s953_s9, 3 }
  0x2e   : > { %p108_p3 = pnand %p784_p9, %p107_p1 }
  0x2f   : > { %s1081_s23 = sand.u32 (!%p108_p3), 1, %s945_s7  }
  0x30   : > { %111 = sbr.rel (%p108_p3) target bundleno = 599 (0x257), region = 24  ;;  %s785_s24 = sshll.u32 (!%p108_p3), %s1081_s23, 6 }
  0x31   : > { %s114_s26 = scalar_lea.sflag (!%p108_p3), [#allocation3], %s1081_s23  ;;  %s117_s30 = scalar_lea.vmem (!%p108_p3), [#allocation2], %s785_s24 }
  0x37   : > { %932 = dma.done.wait (%p1020_p6), %s114_s26, 1024  }
  0x38   : > { %934 = vsyncadd (%p1020_p6), %s114_s26, 4294966272  ;;  %v1091_v0 = vld [vmem:[%s117_s30] sm:$0xff]  ;;  %v1093_v1 = vld [vmem:[%s117_s30 + $0x10] sm:$0xff]  ;;  %s958_s25 = smov 16   ;;  %s959_s17 = smov 114   ;;  %v960_v8 = vmov 1  }
  0x39   : > { %147 = vrot.lane.b32.xlu0 %v1091_v0, %s958_s25  ;;  %153 = vrot.lane.b32.xlu1 %v1093_v1, %s958_s25  ;;  %v1099_v2 = vld [vmem:[%s117_s30 + $0x8] sm:$0xff]  ;;  %v1101_v3 = vld [vmem:[%s117_s30 + $0x18] sm:$0xff]  ;;  %vm146_vm0 = vcmask 1047680   ;;  %s961_s27 = smov 14   ;;  %v962_v41 = vmov 14   ;;  %s963_s28 = smov 113  }
  0x3a   : > { %v1107_v4 = vld [vmem:[%s117_s30 + $0x20] sm:$0xff]  ;;  %v1109_v5 = vld [vmem:[%s117_s30 + $0x28] sm:$0xff]  ;;  %v1115_v6 = vld [vmem:[%s117_s30 + $0x30] sm:$0xff]  ;;  %854 = vset.pattern.permute.xlu1 %v960_v8  ;;  %853 = vset.pattern.permute.xlu0 %v960_v8  ;;  %vm680_vm7 = vcmask 130048   ;;  %s1327_s29 = scalar_lea.vmem [#allocation5], %s785_s24  ;;  %s796_s2 = sshll.u32 %s998_s10, 10 }
  0x3b   : > { %v1117_v7 = vld [vmem:[%s117_s30 + $0x38] sm:$0xff]  ;;  %s704_s3 = sshll.u32 %s1327_s29, 4  ;;  %s1389_s11 = scalar_lea.hbm %s1440_s1, %s796_s2  ;;  %s1391_s3 = int_to_ptr.vmem [resolvable:$true] %s704_s3 }
  0x3c   : > { %s690_s10 = scalar_lea.sflag [#allocation4], %s1081_s23  ;;  %s887_s13 = scalar_lea.vmem %s1391_s3, 1024 }
  0x3d   : > { %150 = vrot.lane.b32.xlu0 %v1099_v2, %s958_s25  ;;  %156 = vrot.lane.b32.xlu1 %v1101_v3, %s958_s25  ;;  %p888_p6 = scmp.ne.s32.totalorder %s1391_s3, %s887_s13  ;;  %p1447_p11 = scmp.ne.s32.totalorder %s1444_s18, 0 }
  0x3e   : > { %s964_s14 = smov [#allocation5]  }
  0x3f   : > { %p889_p12 = pnand %p888_p6, %p1447_p11  ;;  %s891_s16 = sshll.u32 %s964_s14, 4  ;;  %s892_s16 = int_to_ptr.vmem [resolvable:$false] %s891_s16 }
  0x40   : > { %s893_s20 = scalar_lea.vmem %s892_s16, 2048  ;;  %p894_p8 = scmp.lt.s32.totalorder %s1391_s3, %s892_s16 }
  0x41   : > { %159 = vrot.lane.b32.xlu0 %v1107_v4, %s958_s25  ;;  %162 = vrot.lane.b32.xlu1 %v1109_v5, %s958_s25  ;;  %p890_p13 = pneg %p889_p12  ;;  %p895_p10 = scmp.lt.s32.totalorder %s893_s20, %s887_s13 }
  0x43   : > { %p896_p0 = por %p895_p10, %p894_p8 }
  0x45   : > { %165 = vrot.lane.b32.xlu0 %v1115_v6, %s958_s25  ;;  %168 = vrot.lane.b32.xlu1 %v1117_v7, %s958_s25  ;;  %p897_p2 = pnand %p896_p0, %p890_p13 }
  0x49   : > { %248 = vrot.lane.b32.xlu1 %v1099_v2, %s959_s17  ;;  %246 = vrot.lane.b32.xlu0 %v1091_v0, %s959_s17 }
  0x4d   : > { %252 = vrot.lane.b32.xlu1 %v1101_v3, %s959_s17  ;;  %250 = vrot.lane.b32.xlu0 %v1093_v1, %s959_s17 }
  0x51   : > { %256 = vrot.lane.b32.xlu1 %v1109_v5, %s959_s17  ;;  %254 = vrot.lane.b32.xlu0 %v1107_v4, %s959_s17 }
  0x55   : > { %260 = vrot.lane.b32.xlu1 %v1117_v7, %s959_s17  ;;  %258 = vrot.lane.b32.xlu0 %v1115_v6, %s959_s17 }
  0xab   : > { %v148_v9 = vpop.permute.xlu0 %147  ;;  %v154_v10 = vpop.permute.xlu1 %153 }
  0xac   : > { %v149_v11 = vsel %vm146_vm0, %v148_v9, %v1091_v0  ;;  %v155_v12 = vsel %vm146_vm0, %v154_v10, %v1093_v1 }
  0xad   : > { %171 = vrot.lane.b32.xlu0 %v149_v11, %s958_s25 }
  0xaf   : > { %v151_v13 = vpop.permute.xlu0 %150  ;;  %v157_v14 = vpop.permute.xlu1 %156 }
  0xb0   : > { %v152_v15 = vsel %vm146_vm0, %v151_v13, %v1099_v2  ;;  %v158_v16 = vsel %vm146_vm0, %v157_v14, %v1101_v3 }
  0xb1   : > { %175 = vrot.lane.b32.xlu0 %v155_v12, %s958_s25  ;;  %173 = vrot.lane.b32.xlu1 %v152_v15, %s958_s25 }
  0xb3   : > { %v160_v17 = vpop.permute.xlu0 %159  ;;  %v163_v18 = vpop.permute.xlu1 %162 }
  0xb4   : > { %v161_v19 = vsel %vm146_vm0, %v160_v17, %v1107_v4  ;;  %v164_v20 = vsel %vm146_vm0, %v163_v18, %v1109_v5 }
  0xb5   : > { %177 = vrot.lane.b32.xlu1 %v158_v16, %s958_s25  ;;  %179 = vrot.lane.b32.xlu0 %v161_v19, %s958_s25 }
  0xb7   : > { %v166_v21 = vpop.permute.xlu0 %165  ;;  %v169_v22 = vpop.permute.xlu1 %168 }
  0xb8   : > { %v167_v23 = vsel %vm146_vm0, %v166_v21, %v1115_v6  ;;  %v170_v24 = vsel %vm146_vm0, %v169_v22, %v1117_v7 }
  0xb9   : > { %181 = vrot.lane.b32.xlu1 %v164_v20, %s958_s25  ;;  %183 = vrot.lane.b32.xlu0 %v167_v23, %s958_s25 }
  0xbb   : > { %v249_v25 = vpop.permute.xlu1 %248  ;;  %v247_v26 = vpop.permute.xlu0 %246 }
  0xbc   : > { %v270_v28 = vsub.f32 %v1091_v0, %v247_v26  ;;  %v271_v31 = vsub.f32 %v1099_v2, %v249_v25 }
  0xbd   : > { %185 = vrot.lane.b32.xlu1 %v170_v24, %s958_s25  ;;  %401 = vrot.lane.b32.xlu0 %v1099_v2, %s961_s27 }
  0xbf   : > { %v253_v27 = vpop.permute.xlu1 %252  ;;  %v251_v29 = vpop.permute.xlu0 %250 }
  0xc0   : > { %v273_v32 = vsub.f32 %v1101_v3, %v253_v27  ;;  %v272_v34 = vsub.f32 %v1093_v1, %v251_v29 }
  0xc1   : > { %399 = vrot.lane.b32.xlu1 %v1091_v0, %s961_s27  ;;  %405 = vrot.lane.b32.xlu0 %v1101_v3, %s961_s27 }
  0xc3   : > { %v257_v30 = vpop.permute.xlu1 %256  ;;  %v255_v33 = vpop.permute.xlu0 %254 }
  0xc4   : > { %v275_v35 = vsub.f32 %v1109_v5, %v257_v30  ;;  %v274_v37 = vsub.f32 %v1107_v4, %v255_v33 }
  0xc5   : > { %403 = vrot.lane.b32.xlu1 %v1093_v1, %s961_s27  ;;  %409 = vrot.lane.b32.xlu0 %v1109_v5, %s961_s27 }
  0xc7   : > { %v261_v36 = vpop.permute.xlu1 %260  ;;  %v259_v39 = vpop.permute.xlu0 %258 }
  0xc8   : > { %v277_v38 = vsub.f32 %v1117_v7, %v261_v36  ;;  %v276_v40 = vsub.f32 %v1115_v6, %v259_v39 }
  0xc9   : > { %407 = vrot.lane.b32.xlu1 %v1107_v4, %s961_s27  ;;  %413 = vrot.lane.b32.xlu0 %v1117_v7, %s961_s27 }
  0xcd   : > { %411 = vrot.lane.b32.xlu1 %v1115_v6, %s961_s27  ;;  %280 = vperm.xlu0 %853, %v270_v28  }
  0xd1   : > { %285 = vperm.xlu1 %854, %v271_v31   ;;  %295 = vperm.xlu0 %853, %v273_v32  }
  0xd5   : > { %290 = vperm.xlu1 %854, %v272_v34   ;;  %305 = vperm.xlu0 %853, %v275_v35  }
  0xd9   : > { %300 = vperm.xlu1 %854, %v274_v37   ;;  %315 = vperm.xlu0 %853, %v277_v38  }
  0xdd   : > { %310 = vperm.xlu1 %854, %v276_v40   ;;  %856 = vset.pattern.permute.xlu0 %v962_v41 }
  0xe1   : > { %855 = vset.pattern.permute.xlu1 %v962_v41 }
 0x11f   : > { %v172_v42 = vpop.permute.xlu0 %171 }
 0x120   : > { %v187_v43 = vsel %vm146_vm0, %v172_v42, %v1091_v0 }
 0x121   : > { %203 = vrot.lane.b32.xlu1 %v187_v43, %s961_s27 }
 0x123   : > { %v174_v44 = vpop.permute.xlu1 %173  ;;  %v176_v45 = vpop.permute.xlu0 %175 }
 0x124   : > { %v188_v46 = vsel %vm146_vm0, %v174_v44, %v1099_v2  ;;  %v189_v47 = vsel %vm146_vm0, %v176_v45, %v1093_v1 }
 0x125   : > { %205 = vrot.lane.b32.xlu0 %v188_v46, %s961_s27  ;;  %207 = vrot.lane.b32.xlu1 %v189_v47, %s961_s27 }
 0x127   : > { %v178_v48 = vpop.permute.xlu1 %177  ;;  %v180_v49 = vpop.permute.xlu0 %179 }
 0x128   : > { %v190_v50 = vsel %vm146_vm0, %v178_v48, %v1101_v3  ;;  %v191_v51 = vsel %vm146_vm0, %v180_v49, %v1107_v4 }
 0x129   : > { %209 = vrot.lane.b32.xlu0 %v190_v50, %s961_s27  ;;  %211 = vrot.lane.b32.xlu1 %v191_v51, %s961_s27 }
 0x12b   : > { %v182_v52 = vpop.permute.xlu1 %181  ;;  %v184_v53 = vpop.permute.xlu0 %183 }
 0x12c   : > { %v192_v54 = vsel %vm146_vm0, %v182_v52, %v1109_v5  ;;  %v1198_v55 = vsel %vm146_vm0, %v184_v53, %v1115_v6 }
 0x12d   : > { %213 = vrot.lane.b32.xlu0 %v192_v54, %s961_s27  ;;  %215 = vrot.lane.b32.xlu1 %v1198_v55, %s961_s27 }
 0x12f   : > { %v186_v56 = vpop.permute.xlu1 %185  ;;  %v402_v57 = vpop.permute.xlu0 %401 }
 0x130   : > { %v1205_v58 = vsel %vm146_vm0, %v186_v56, %v1117_v7  ;;  %v424_v59 = vsub.f32 %v1099_v2, %v402_v57 }
 0x131   : > { %217 = vrot.lane.b32.xlu0 %v1205_v58, %s961_s27 }
 0x133   : > { %v400_v60 = vpop.permute.xlu1 %399  ;;  %v406_v61 = vpop.permute.xlu0 %405 }
 0x134   : > { %v423_v62 = vsub.f32 %v1091_v0, %v400_v60  ;;  %v426_v10 = vsub.f32 %v1101_v3, %v406_v61 }
 0x135   : > { %438 = vperm.xlu0 %856, %v424_v59   ;;  %v235_v59 = vlaneseq }
 0x136   : > { %433 = vperm.xlu1 %855, %v423_v62  }
 0x137   : > { %v404_v63 = vpop.permute.xlu1 %403  ;;  %v410_v9 = vpop.permute.xlu0 %409  ;;  %v1241_v62 = vand.u32 127, %v235_v59 }
 0x138   : > { %v425_v8 = vsub.f32 %v1093_v1, %v404_v63  ;;  %v428_v13 = vsub.f32 %v1109_v5, %v410_v9 }
 0x139   : > { %vm237_vm1 = vcmp.eq.s32.totalorder %v1241_v62, 0  ;;  %vm398_vm2 = vcmp.eq.s32.totalorder %v1241_v62, 15 }
 0x13a   : > { %443 = vperm.xlu1 %855, %v425_v8  }
 0x13b   : > { %v408_v11 = vpop.permute.xlu1 %407  ;;  %v414_v15 = vpop.permute.xlu0 %413 }
 0x13c   : > { %v427_v12 = vsub.f32 %v1107_v4, %v408_v11  ;;  %v430_v17 = vsub.f32 %v1117_v7, %v414_v15  ;;  %v487_v15 = vmul.f32 0.45186275, %v1091_v0 }
 0x13e   : > { %448 = vperm.xlu1 %855, %v426_v10   ;;  %453 = vperm.xlu0 %856, %v427_v12  }
 0x13f   : > { %v412_v14 = vpop.permute.xlu1 %411 }
 0x140   : > { %v429_v16 = vsub.f32 %v1115_v6, %v412_v14 }
 0x142   : > { %458 = vperm.xlu1 %855, %v428_v13   ;;  %463 = vperm.xlu0 %856, %v429_v16   ;;  %v1247_v13 = vshrl.u32 %v235_v59, 7 }
 0x144   : > { %vm521_vm3 = vcmp.lt.s32.totalorder %v1247_v13, 1  ;;  %vm538_vm4 = vcmp.lt.s32.totalorder %v1247_v13, 7  ;;  %vm556_vm6 = vcmp.eq.s32.totalorder %v1247_v13, 0 }
 0x146   : > { %468 = vperm.xlu1 %855, %v430_v17  }
 0x14c   : > { %v281_v19 = vpop.permute.xlu0 %280 }
 0x150   : > { %v286_v18 = vpop.permute.xlu1 %285  ;;  %v296_v21 = vpop.permute.xlu0 %295 }
 0x154   : > { %v291_v20 = vpop.permute.xlu1 %290  ;;  %v306_v23 = vpop.permute.xlu0 %305 }
 0x158   : > { %v301_v22 = vpop.permute.xlu1 %300  ;;  %v316_v25 = vpop.permute.xlu0 %315 }
 0x15c   : > { %v311_v24 = vpop.permute.xlu1 %310 }
 0x193   : > { %v204_v26 = vpop.permute.xlu1 %203 }
 0x194   : > { %v227_v27 = vadd.f32 %v204_v26, %v187_v43 }
 0x196   : > { %366 = vrot.lane.b32.xlu0 %v227_v27, %s963_s28  ;;  %v318_v37 = vadd.f32 %v281_v19, %v227_v27 }
 0x197   : > { %v208_v28 = vpop.permute.xlu1 %207  ;;  %v206_v29 = vpop.permute.xlu0 %205 }
 0x198   : > { %v229_v30 = vadd.f32 %v208_v28, %v189_v47  ;;  %v228_v31 = vadd.f32 %v206_v29, %v188_v46  ;;  %v1267_v29 = vsub.s32 1, %v1247_v13 }
 0x19a   : > { %370 = vrot.lane.b32.xlu0 %v229_v30, %s963_s28  ;;  %368 = vrot.lane.b32.xlu1 %v228_v31, %s963_s28  ;;  %v320_v39 = vadd.f32 %v291_v20, %v229_v30  ;;  %v319_v40 = vadd.f32 %v286_v18, %v228_v31  ;;  %v1270_v30 = vsub.s32 6, %v1247_v13 }
 0x19b   : > { %v212_v32 = vpop.permute.xlu1 %211  ;;  %v210_v33 = vpop.permute.xlu0 %209 }
 0x19c   : > { %v231_v34 = vadd.f32 %v212_v32, %v191_v51  ;;  %v230_v35 = vadd.f32 %v210_v33, %v190_v50  ;;  %v490_v32 = vmul.f32 0.45186275, %v1101_v3 }
 0x19e   : > { %374 = vrot.lane.b32.xlu0 %v231_v34, %s963_s28  ;;  %372 = vrot.lane.b32.xlu1 %v230_v35, %s963_s28  ;;  %v322_v42 = vadd.f32 %v301_v22, %v231_v34  ;;  %v321_v43 = vadd.f32 %v296_v21, %v230_v35  ;;  %v1257_v21 = vadd.s32 8, %v1247_v13 }
 0x19f   : > { %v214_v36 = vpop.permute.xlu0 %213  ;;  %v216_v41 = vpop.permute.xlu1 %215 }
 0x1a0   : > { %v232_v38 = vadd.f32 %v214_v36, %v192_v54  ;;  %v233_v44 = vadd.f32 %v216_v41, %v1198_v55  ;;  %vm607_vm5 = vcmp.eq.s32.totalorder %v1257_v21, 15 }
 0x1a2   : > { %334 = vrot.lane.b32.xlu0 %v318_v37, %s963_s28  ;;  %376 = vrot.lane.b32.xlu1 %v232_v38, %s963_s28  ;;  %v324_v46 = vadd.f32 %v311_v24, %v233_v44  ;;  %v323_v47 = vadd.f32 %v306_v23, %v232_v38  ;;  %v488_v24 = vmul.f32 0.45186275, %v1099_v2  ;;  %v489_v2 = vmul.f32 0.45186275, %v1093_v1 }
 0x1a3   : > { %v218_v45 = vpop.permute.xlu0 %217  ;;  %v491_v37 = vmul.f32 0.45186275, %v1107_v4 }
 0x1a4   : > { %v234_v48 = vadd.f32 %v218_v45, %v1205_v58 }
 0x1a6   : > { %338 = vrot.lane.b32.xlu0 %v320_v39, %s963_s28  ;;  %336 = vrot.lane.b32.xlu1 %v319_v40, %s963_s28  ;;  %v325_v49 = vadd.f32 %v316_v25, %v234_v48  ;;  %v1282_v40 = vmul.f32 0.45186275, %v1109_v5 }
 0x1aa   : > { %342 = vrot.lane.b32.xlu0 %v322_v42, %s963_s28  ;;  %340 = vrot.lane.b32.xlu1 %v321_v43, %s963_s28  ;;  %v1285_v42 = vmul.f32 0.45186275, %v1115_v6 }
 0x1ae   : > { %346 = vrot.lane.b32.xlu0 %v324_v46, %s963_s28  ;;  %344 = vrot.lane.b32.xlu1 %v323_v47, %s963_s28  ;;  %v1288_v46 = vmul.f32 0.45186275, %v1117_v7 }
 0x1b2   : > { %378 = vrot.lane.b32.xlu0 %v233_v44, %s963_s28  ;;  %348 = vrot.lane.b32.xlu1 %v325_v49, %s963_s28 }
 0x1b4   : > { %v439_v52 = vpop.permute.xlu0 %438 }
 0x1b5   : > { %v434_v50 = vpop.permute.xlu1 %433 }
 0x1b6   : > { %380 = vrot.lane.b32.xlu1 %v234_v48, %s963_s28 }
 0x1b9   : > { %v444_v51 = vpop.permute.xlu1 %443 }
 0x1bd   : > { %v449_v53 = vpop.permute.xlu1 %448  ;;  %v454_v54 = vpop.permute.xlu0 %453 }
 0x1c1   : > { %v1235_v55 = vpop.permute.xlu1 %458  ;;  %v1237_v56 = vpop.permute.xlu0 %463 }
 0x1c5   : > { %v1239_v57 = vpop.permute.xlu1 %468 }
 0x208   : > { %v367_v58 = vpop.permute.xlu0 %366 }
 0x20c   : > { %v369_v60 = vpop.permute.xlu1 %368  ;;  %v371_v61 = vpop.permute.xlu0 %370 }
 0x210   : > { %v373_v63 = vpop.permute.xlu1 %372  ;;  %v375_v8 = vpop.permute.xlu0 %374 }
 0x214   : > { %v377_v9 = vpop.permute.xlu1 %376  ;;  %v335_v10 = vpop.permute.xlu0 %334 }
 0x215   : > { %v390_v11 = vsel %vm237_vm1, %v335_v10, %v367_v58 }
 0x216   : > { %v471_v12 = vadd.f32 %v434_v50, %v390_v11 }
 0x218   : > { %v479_v14 = vsel %vm398_vm2, %v471_v12, %v390_v11  ;;  %v337_v16 = vpop.permute.xlu1 %336  ;;  %v339_v17 = vpop.permute.xlu0 %338 }
 0x219   : > { %v495_v18 = vmul.f32 0.27406862, %v479_v14  ;;  %v391_v19 = vsel %vm237_vm1, %v337_v16, %v369_v60  ;;  %v392_v20 = vsel %vm237_vm1, %v339_v17, %v371_v61 }
 0x21a   : > { %v472_v22 = vadd.f32 %v439_v52, %v391_v19  ;;  %v473_v23 = vadd.f32 %v444_v51, %v392_v20 }
 0x21b   : > { %v503_v25 = vadd.f32 %v495_v18, %v487_v15 }
 0x21c   : > { %v480_v0 = vsel %vm398_vm2, %v472_v22, %v391_v19  ;;  %v481_v26 = vsel %vm398_vm2, %v473_v23, %v392_v20  ;;  %v341_v27 = vpop.permute.xlu1 %340  ;;  %v343_v28 = vpop.permute.xlu0 %342 }
 0x21d   : > { %v496_v31 = vmul.f32 0.27406862, %v480_v0  ;;  %v393_v33 = vsel %vm237_vm1, %v341_v27, %v373_v63  ;;  %v394_v34 = vsel %vm237_vm1, %v343_v28, %v375_v8  ;;  %v497_v35 = vmul.f32 0.27406862, %v481_v26 }
 0x21e   : > { %v474_v36 = vadd.f32 %v449_v53, %v393_v33  ;;  %v475_v38 = vadd.f32 %v454_v54, %v394_v34  ;;  %v612_v39 = vrot.slane %v503_v25, 2  ;;  %v511_v43 = vrot.slane %v503_v25, 7 }
 0x21f   : > { %v504_v1 = vadd.f32 %v496_v31, %v488_v24  ;;  %v530_v44 = vrot.slane %v503_v25, 1  ;;  %v656_v45 = vmul.f32 0.45186275, %v503_v25  ;;  %v505_v50 = vadd.f32 %v497_v35, %v489_v2 }
 0x220   : > { %v345_v41 = vpop.permute.xlu1 %344  ;;  %v347_v3 = vpop.permute.xlu0 %346  ;;  %v482_v5 = vsel %vm398_vm2, %v474_v36, %v393_v33  ;;  %v483_v51 = vsel %vm398_vm2, %v475_v38, %v394_v34 }
 0x221   : > { %v515_v4 = vrot.slane %v504_v1, 7  ;;  %v534_v47 = vrot.slane %v504_v1, 1  ;;  %v562_v48 = vrot.slane %v504_v1, 6  ;;  %v620_v49 = vsub.f32 %v504_v1, %v612_v39 }
 0x222   : > { %v395_v6 = vsel %vm237_vm1, %v345_v41, %v377_v9  ;;  %v657_v9 = vmul.f32 0.45186275, %v504_v1  ;;  %v498_v10 = vmul.f32 0.27406862, %v482_v5  ;;  %v499_v11 = vmul.f32 0.27406862, %v483_v51 }
 0x223   : > { %v522_v52 = vsel %vm521_vm3, %v511_v43, %v515_v4  ;;  %v526_v7 = vsel %vm521_vm3, %v515_v4, %v511_v43  ;;  %v539_v53 = vsel %vm538_vm4, %v530_v44, %v534_v47  ;;  %v543_v54 = vsel %vm538_vm4, %v534_v47, %v530_v44 }
 0x224   : > { %v547_v58 = vadd.f32 %v539_v53, %v526_v7  ;;  %v548_v59 = vadd.f32 %v543_v54, %v522_v52  ;;  %v570_v60 = vsub.f32 %v503_v25, %v562_v48  ;;  %v627_v61 = vrot.slane %v620_v49, %v1270_v30  ;;  %v349_v63 = vpop.permute.xlu1 %348  ;;  %v379_v8 = vpop.permute.xlu0 %378 }
 0x225   : > { %v476_v12 = vadd.f32 %v1235_v55, %v395_v6  ;;  %v512_v16 = vrot.slane %v505_v50, 7  ;;  %v531_v17 = vrot.slane %v505_v50, 1  ;;  %v613_v18 = vrot.slane %v505_v50, 2 }
 0x226   : > { %v577_v14 = vrot.slane %v570_v60, %v1267_v29  ;;  %v641_v15 = vadd.f32 %v627_v61, %v548_v59  ;;  %v506_v19 = vadd.f32 %v498_v10, %v490_v32  ;;  %v396_v22 = vsel %vm237_vm1, %v347_v3, %v379_v8 }
 0x227   : > { %v484_v20 = vsel %vm398_vm2, %v476_v12, %v395_v6  ;;  %v658_v25 = vmul.f32 0.45186275, %v505_v50  ;;  %v507_v0 = vadd.f32 %v499_v11, %v491_v37  ;;  %v477_v33 = vadd.f32 %v1237_v56, %v396_v22 }
 0x228   : > { %v590_v23 = vadd.f32 %v577_v14, %v547_v58  ;;  %v649_v24 = vsel %vm607_vm5, %v641_v15, %v548_v59  ;;  %v516_v26 = vrot.slane %v506_v19, 7  ;;  %v535_v27 = vrot.slane %v506_v19, 1  ;;  %v381_v34 = vpop.permute.xlu1 %380 }
 0x229   : > { %v665_v55 = vmul.f32 0.27406862, %v649_v24  ;;  %v563_v28 = vrot.slane %v506_v19, 6  ;;  %v621_v31 = vsub.f32 %v506_v19, %v613_v18  ;;  %v500_v32 = vmul.f32 0.27406862, %v484_v20 }
 0x22a   : > { %v598_v2 = vsel %vm556_vm6, %v590_v23, %v547_v58  ;;  %v523_v38 = vsel %vm521_vm3, %v512_v16, %v516_v26  ;;  %v527_v37 = vsel %vm521_vm3, %v516_v26, %v512_v16  ;;  %v540_v39 = vsel %vm538_vm4, %v531_v17, %v535_v27 }
 0x22b   : > { %v664_v35 = vmul.f32 0.27406862, %v598_v2  ;;  %v673_v36 = vadd.f32 %v665_v55, %v657_v9  ;;  %v544_v1 = vsel %vm538_vm4, %v535_v27, %v531_v17  ;;  %v571_v41 = vsub.f32 %v505_v50, %v563_v28 }
 0x22c   : > { %v631_v3 = vrot.slane %v621_v31, %v1270_v30  ;;  %v549_v56 = vadd.f32 %v540_v39, %v527_v37  ;;  %v550_v44 = vadd.f32 %v544_v1, %v523_v38  ;;  %v397_v4 = vsel %vm237_vm1, %v349_v63, %v381_v34 }
 0x22d   : > { %v672_v43 = vadd.f32 %v664_v35, %v656_v45  ;;  %682 = vst.msk [vmem:[%s1327_s29 + $0x8] sm:$0xff] %vm680_vm7, %v673_v36  ;;  %v581_v47 = vrot.slane %v571_v41, %v1267_v29  ;;  %v659_v48 = vmul.f32 0.45186275, %v506_v19  ;;  %v513_v49 = vrot.slane %v507_v0, 7 }
 0x22e   : > { %v508_v50 = vadd.f32 %v500_v32, %v1282_v40  ;;  %v643_v45 = vadd.f32 %v631_v3, %v550_v44  ;;  %v532_v5 = vrot.slane %v507_v0, 1  ;;  %v614_v51 = vrot.slane %v507_v0, 2 }
 0x22f   : > { %681 = vst.msk [vmem:[%s1327_s29] sm:$0xff] %vm680_vm7, %v672_v43  ;;  %v485_v6 = vsel %vm398_vm2, %v477_v33, %v396_v22  ;;  %v592_v52 = vadd.f32 %v581_v47, %v549_v56  ;;  %v478_v61 = vadd.f32 %v1239_v57, %v397_v4  ;;  %v660_v55 = vmul.f32 0.45186275, %v507_v0 }
 0x230   : > { %v517_v7 = vrot.slane %v508_v50, 7  ;;  %v536_v53 = vrot.slane %v508_v50, 1  ;;  %v564_v54 = vrot.slane %v508_v50, 6  ;;  %v651_v58 = vsel %vm607_vm5, %v643_v45, %v550_v44 }
 0x231   : > { %v622_v59 = vsub.f32 %v508_v50, %v614_v51  ;;  %v501_v60 = vmul.f32 0.27406862, %v485_v6  ;;  %v600_v40 = vsel %vm556_vm6, %v592_v52, %v549_v56  ;;  %v667_v63 = vmul.f32 0.27406862, %v651_v58 }
 0x232   : > { %v524_v8 = vsel %vm521_vm3, %v513_v49, %v517_v7  ;;  %v528_v9 = vsel %vm521_vm3, %v517_v7, %v513_v49  ;;  %v666_v10 = vmul.f32 0.27406862, %v600_v40  ;;  %v541_v11 = vsel %vm538_vm4, %v532_v5, %v536_v53 }
 0x233   : > { %v545_v12 = vsel %vm538_vm4, %v536_v53, %v532_v5  ;;  %v572_v57 = vsub.f32 %v507_v0, %v564_v54  ;;  %v675_v14 = vadd.f32 %v667_v63, %v659_v48  ;;  %v551_v15 = vadd.f32 %v541_v11, %v528_v9 }
 0x234   : > { %v552_v16 = vadd.f32 %v545_v12, %v524_v8  ;;  %v635_v17 = vrot.slane %v622_v59, %v1270_v30  ;;  %v674_v18 = vadd.f32 %v666_v10, %v658_v25  ;;  %v509_v20 = vadd.f32 %v501_v60, %v1285_v42 }
 0x235   : > { %v585_v19 = vrot.slane %v572_v57, %v1267_v29  ;;  %v486_v22 = vsel %vm398_vm2, %v478_v61, %v397_v4  ;;  %684 = vst.msk [vmem:[%s1327_s29 + $0x18] sm:$0xff] %vm680_vm7, %v675_v14  ;;  %v661_v28 = vmul.f32 0.45186275, %v508_v50 }
 0x236   : > { %v645_v23 = vadd.f32 %v635_v17, %v552_v16  ;;  %v502_v24 = vmul.f32 0.27406862, %v486_v22  ;;  %683 = vst.msk [vmem:[%s1327_s29 + $0x10] sm:$0xff] %vm680_vm7, %v674_v18  ;;  %v514_v25 = vrot.slane %v509_v20, 7  ;;  %v533_v31 = vrot.slane %v509_v20, 1 }
 0x237   : > { %v594_v26 = vadd.f32 %v585_v19, %v551_v15  ;;  %v615_v32 = vrot.slane %v509_v20, 2  ;;  %v662_v5 = vmul.f32 0.45186275, %v509_v20 }
 0x238   : > { %v653_v27 = vsel %vm607_vm5, %v645_v23, %v552_v16  ;;  %v510_v2 = vadd.f32 %v502_v24, %v1288_v46 }
 0x239   : > { %v602_v62 = vsel %vm556_vm6, %v594_v26, %v551_v15  ;;  %v669_v42 = vmul.f32 0.27406862, %v653_v27 }
 0x23a   : > { %v668_v33 = vmul.f32 0.27406862, %v602_v62  ;;  %v518_v34 = vrot.slane %v510_v2, 7  ;;  %v537_v35 = vrot.slane %v510_v2, 1  ;;  %v565_v0 = vrot.slane %v510_v2, 6 }
 0x23b   : > { %v677_v36 = vadd.f32 %v669_v42, %v661_v28  ;;  %v623_v38 = vsub.f32 %v510_v2, %v615_v32 }
 0x23c   : > { %v676_v37 = vadd.f32 %v668_v33, %v660_v55  ;;  %v525_v39 = vsel %vm521_vm3, %v514_v25, %v518_v34  ;;  %v529_v46 = vsel %vm521_vm3, %v518_v34, %v514_v25  ;;  %v542_v1 = vsel %vm538_vm4, %v533_v31, %v537_v35 }
 0x23d   : > { %686 = vst.msk [vmem:[%s1327_s29 + $0x28] sm:$0xff] %vm680_vm7, %v677_v36  ;;  %v546_v41 = vsel %vm538_vm4, %v537_v35, %v533_v31  ;;  %v553_v3 = vadd.f32 %v542_v1, %v529_v46  ;;  %v573_v43 = vsub.f32 %v509_v20, %v565_v0  ;;  %v639_v56 = vrot.slane %v623_v38, %v1270_v30 }
 0x23e   : > { %685 = vst.msk [vmem:[%s1327_s29 + $0x20] sm:$0xff] %vm680_vm7, %v676_v37  ;;  %v554_v44 = vadd.f32 %v546_v41, %v525_v39  ;;  %v663_v30 = vmul.f32 0.45186275, %v510_v2 }
 0x23f   : > { %v589_v4 = vrot.slane %v573_v43, %v1267_v29 }
 0x240   : > { %v647_v47 = vadd.f32 %v639_v56, %v554_v44 }
 0x241   : > { %v596_v48 = vadd.f32 %v589_v4, %v553_v3 }
 0x242   : > { %v655_v49 = vsel %vm607_vm5, %v647_v47, %v554_v44 }
 0x243   : > { %v604_v50 = vsel %vm556_vm6, %v596_v48, %v553_v3  ;;  %v671_v45 = vmul.f32 0.27406862, %v655_v49 }
 0x244   : > { %v670_v51 = vmul.f32 0.27406862, %v604_v50 }
 0x245   : > { %v679_v6 = vadd.f32 %v671_v45, %v663_v30 }
 0x246   : > { %v678_v21 = vadd.f32 %v670_v51, %v662_v5 }
 0x247   : > { %688 = vst.msk [vmem:[%s1327_s29 + $0x38] sm:$0xff] %vm680_vm7, %v679_v6 }
 0x248   : > { %687 = vst.msk [vmem:[%s1327_s29 + $0x30] sm:$0xff] %vm680_vm7, %v678_v21 }
 0x249   : > { %900 = shalt.err (!%p897_p2)
}
 0x24a   : > { %s901_s21 = scalar_lea.hbm %s1389_s11, 1024  ;;  %s905_s26 = scalar_lea.hbm %s1440_s1, 2048 }
 0x24b   : > { %p902_p4 = scmp.ne.s32.totalorder %s1389_s11, %s901_s21  ;;  %p906_p9 = scmp.lt.u32.totalorder %s1389_s11, %s1440_s1 }
 0x24c   : > { %p907_p1 = scmp.lt.u32.totalorder %s905_s26, %s901_s21  ;;  %p909_p6 = scmp.lt.u32.totalorder %s901_s21, %s1389_s11 }
 0x24d   : > { %p903_p5 = pnand %p902_p4, %p1447_p11 }
 0x24e   : > { %p908_p3 = por %p907_p1, %p906_p9 }
 0x24f   : > { %p904_p7 = pneg %p903_p5 }
 0x250   : > { %p910_p12 = por %p909_p6, %p908_p3 }
 0x252   : > { %p911_p13 = pnand %p910_p12, %p904_p7 }
 0x254   : > { %914 = shalt.err (!%p911_p13)
}
 0x255   : > { %s965_s17 = smov 128   ;;  %s966_s27 = smov 8  }
 0x256   : > { %799 = dma.vmem_to_hbm [thread:$0]  (%p1447_p11), %s1391_s3, 1024, %s1389_s11, %s690_s10, %s965_s17, %s965_s17, %s966_s27  }
 0x257 PF: > { %s719_s28 = sand.u32 1, %s941_s6   ;;  %p1448_p8 = scmp.ne.s32.totalorder %s1445_s19, 0 }
 0x258   : > { %p1449_p10 = scmp.ge.s32.totalorder %s953_s9, 2  ;;  %s720_s29 = scalar_lea.sflag [#allocation4], %s719_s28 }
 0x25a   : > { %p806_p0 = pnand %p1449_p10, %p1448_p8 }
 0x25c   : > { %936 = dma.done.wait (!%p806_p0), %s720_s29, 1024  }
 0x25d   : > { %938 = vsyncadd (!%p806_p0), %s720_s29, 4294966272  ;;  %p14_p2 = scmp.ge.s32.totalorder %s1002_s12, 4   ;;  %s1450_s6 = smov %s945_s7 }
 0x25e   : > { %s1451_s7 = smov %s949_s8  ;;  %s1452_s8 = smov %s1014_s15 }
 0x25f   : > { %s1453_s9 = smov %s1002_s12  ;;  %16 = sbr.rel (!%p14_p2) target bundleno = 5 (0x5), region = 69 }
 0x266   :  { %725 = vsyncpa [#allocation3], 1 }
 0x267   :  { %727 = vsyncpa [#allocation3 + $0x1], 1 }
 0x268   :  { %728 = vsyncpa [#allocation4], 1 }
 0x269   :  { %730 = vsyncpa [#allocation4 + $0x1], 1 }

</bundles_post_ra>
